<compile_context>
chip_gen: v5e
topology: v5e:2x2
jax: 0.10.0
libtpu: 0.0.40
codegen_flags: <defaults>
</compile_context>

<pallas_src>
import functools

import jax
import jax.numpy as jnp
from jax.experimental import pallas as pl
from jax.experimental.pallas import tpu as pltpu


def _trans_down_kernel(p_ref, w_ref, o_ref, *, inv_m, eps):
    """One image per grid step.

    p_ref: (1, 9*Cin, M)  im2col patches for this image (M = Ho*Wo, lane axis)
    w_ref: (Cout, 9*Cin)  conv weight, columns ordered (kh, kw, cin)
    o_ref: (1, Cout, M)   normalized + ReLU'd output (NCHW-native)
    """
    p = p_ref[0]                                               # (9*Cin, M)
    w = w_ref[...]                                             # (Cout, 9*Cin)

    # Single MXU matmul, f32 accumulation.
    y = jnp.dot(w, p, preferred_element_type=jnp.float32)      # (Cout, M)

    # Per-(image, channel) InstanceNorm over the lane axis, fused single pass.
    mean = jnp.sum(y, axis=-1, keepdims=True) * inv_m          # (Cout, 1)
    ex2 = jnp.sum(y * y, axis=-1, keepdims=True) * inv_m       # (Cout, 1)
    var = jnp.maximum(ex2 - mean * mean, 0.0)                  # clamp: no NaN
    out = (y - mean) * jax.lax.rsqrt(var + eps)
    out = jnp.maximum(out, 0.0)                                # ReLU

    o_ref[0] = out.astype(o_ref.dtype)


def _vmem_limit_bytes():
    """Generation-aware scoped-VMEM limit (~5/8 of per-core capacity)."""
    cap = 64 * 1024 * 1024  # conservative fallback = v7x per-core VMEM
    try:
        info = pltpu.get_tpu_info()
        cap = int(getattr(info, "vmem_capacity_bytes", cap))
    except Exception:
        pass
    return max(16 * 1024 * 1024, (cap * 5) // 8)


def trans_down(x_nchw, weight_oihw, bias=None, *, compute_dtype=jnp.bfloat16,
               out_dtype=None, eps=1e-5):
    """Forward pass of Trans_Down.

    x_nchw:      (N, Cin, H, W)
    weight_oihw: (Cout, Cin, 3, 3)
    bias:        (Cout,) -- accepted for API parity but unused: it is exactly
                 cancelled by the InstanceNorm(affine=False) mean subtraction.
    out_dtype:   output dtype (default x.dtype). Output is unit-variance
                 post-ReLU, so bf16 is usually adequate and halves store BW.
    returns      (N, Cout, ceil(H/2), ceil(W/2))
    """
    del bias  # cancelled by InstanceNorm; no need to DMA it.

    N, Cin, H, W = x_nchw.shape
    Cout = weight_oihw.shape[0]
    Ho = (H + 2 - 3) // 2 + 1
    Wo = (W + 2 - 3) // 2 + 1
    M = Ho * Wo
    K = 9 * Cin
    out_dtype = out_dtype or x_nchw.dtype

    # ---- wrapper-side NCHW-native im2col (single fused XLA pass) -----------
    # No NCHW<->NHWC transposes: pad spatially, take the 9 stride-2 taps, and
    # concatenate along the channel axis -> (N, 9*Cin, Ho, Wo).
    x_pad = jnp.pad(x_nchw, ((0, 0), (0, 0), (1, 1), (1, 1)))
    taps = []
    for kh in range(3):
        for kw in range(3):
            # Explicit stops so exactly Ho/Wo rows/cols are taken (odd H/W safe).
            taps.append(x_pad[:, :, kh:kh + 2 * Ho - 1:2, kw:kw + 2 * Wo - 1:2])
    patches = jnp.concatenate(taps, axis=1)                    # (N, 9*Cin, Ho, Wo)
    patches = patches.reshape(N, K, M).astype(compute_dtype)

    # (Cout, Cin, 3, 3) -> (Cout, kh, kw, Cin) -> (Cout, 9*Cin); column order
    # k = (kh*3 + kw)*Cin + cin matches the tap concatenation order above.
    w = jnp.transpose(weight_oihw, (0, 2, 3, 1)).reshape(Cout, K)
    w = w.astype(compute_dtype)

    out3d = pl.pallas_call(
        functools.partial(_trans_down_kernel, inv_m=1.0 / M, eps=eps),
        out_shape=jax.ShapeDtypeStruct((N, Cout, M), out_dtype),
        grid=(N,),
        in_specs=[
            pl.BlockSpec((1, K, M), lambda i: (i, 0, 0)),
            pl.BlockSpec((Cout, K), lambda i: (0, 0)),
        ],
        out_specs=pl.BlockSpec((1, Cout, M), lambda i: (i, 0, 0)),
        compiler_params=pltpu.CompilerParams(
            dimension_semantics=("parallel",),
            vmem_limit_bytes=_vmem_limit_bytes(),
        ),
    )(patches, w)

    return out3d.reshape(N, Cout, Ho, Wo)                      # already NCHW


def _reference(x_nchw, weight_oihw, bias):
    """Pure-JAX reference of Conv2d(s=2, p=1) -> InstanceNorm2d -> ReLU."""
    conv = jax.lax.conv_general_dilated(
        x_nchw.astype(jnp.float32), weight_oihw.astype(jnp.float32),
        window_strides=(2, 2), padding=((1, 1), (1, 1)),
        dimension_numbers=("NCHW", "OIHW", "NCHW"))
    conv = conv + bias.reshape(1, -1, 1, 1)
    mean = jnp.mean(conv, axis=(2, 3), keepdims=True)
    var = jnp.mean((conv - mean) ** 2, axis=(2, 3), keepdims=True)
    y = (conv - mean) * jax.lax.rsqrt(var + 1e-5)
    return jnp.maximum(y, 0.0)


if __name__ == "__main__":
    key = jax.random.PRNGKey(0)
    k_x, k_w, k_b, k_x2 = jax.random.split(key, 4)

    N, Cin, H, W = 2, 4, 16, 16
    Cout = 8

    x = jax.random.normal(k_x, (N, Cin, H, W), dtype=jnp.float32)
    fan_in = Cin * 3 * 3
    bound = 1.0 / (fan_in ** 0.5)
    weight = jax.random.uniform(k_w, (Cout, Cin, 3, 3), jnp.float32, -bound, bound)
    bias = jax.random.uniform(k_b, (Cout,), jnp.float32, -bound, bound)

    ref = _reference(x, weight, bias)

    # f32 compute path: tight numerical check against the reference.
    out_f32 = jax.block_until_ready(
        trans_down(x, weight, bias, compute_dtype=jnp.float32))
    assert out_f32.shape == (N, Cout, H // 2, W // 2), out_f32.shape
    assert jnp.allclose(out_f32, ref, atol=1e-4, rtol=1e-4), float(
        jnp.max(jnp.abs(out_f32 - ref)))

    # Default bf16 compute path (f32 accumulation); output is unit-variance
    # normalized, so an absolute tolerance of 5e-2 is meaningful for bf16.
    out_bf16 = jax.block_until_ready(trans_down(x, weight, bias))
    assert out_bf16.shape == (N, Cout, H // 2, W // 2), out_bf16.shape
    assert jnp.allclose(out_bf16, ref, atol=5e-2, rtol=5e-2), float(
        jnp.max(jnp.abs(out_bf16 - ref)))

    # Odd spatial size (ceil(H/2) output, explicit slice stops in the im2col).
    x_odd = jax.random.normal(k_x2, (N, Cin, 15, 15), dtype=jnp.float32)
    ref_odd = _reference(x_odd, weight, bias)
    out_odd = jax.block_until_ready(
        trans_down(x_odd, weight, bias, compute_dtype=jnp.float32))
    assert out_odd.shape == (N, Cout, 8, 8), out_odd.shape
    assert jnp.allclose(out_odd, ref_odd, atol=1e-4, rtol=1e-4), float(
        jnp.max(jnp.abs(out_odd - ref_odd)))

    print("KERNEL_OK")
</pallas_src>

<mosaic_0001>
module attributes {stable_mosaic.version = 11 : i64} {
  func.func @_trans_down_kernel(%arg0: i32, %arg1: memref<1x36x64xf32, #tpu.memory_space<vmem>>, %arg2: memref<8x36xf32, #tpu.memory_space<vmem>>, %arg3: memref<1x8x64xf32, #tpu.memory_space<vmem>>) attributes {dimension_semantics = [#tpu.dimension_semantics<parallel>], iteration_bounds = array<i64: 2>, scalar_prefetch = 0 : i64, scratch_operands = 0 : i64, tpu.core_type = #tpu.core_type<tc>, window_params = [{transform_indices = @transform_0, window_bounds = array<i64: 1, 36, 64>}, {pipeline_mode = #tpu.pipeline_mode<synchronous>, transform_indices = @transform_1, window_bounds = array<i64: 8, 36>}, {transform_indices = @transform_2, window_bounds = array<i64: 1, 8, 64>}]} {
    %c0 = arith.constant 0 : index
    %c0_0 = arith.constant 0 : index
    %c0_1 = arith.constant 0 : index
    %0 = vector.load %arg1[%c0, %c0_0, %c0_1] : memref<1x36x64xf32, #tpu.memory_space<vmem>>, vector<1x36x64xf32>
    %1 = vector.shape_cast %0 : vector<1x36x64xf32> to vector<36x64xf32>
    %c0_2 = arith.constant 0 : index
    %c0_3 = arith.constant 0 : index
    %2 = vector.load %arg2[%c0_2, %c0_3] : memref<8x36xf32, #tpu.memory_space<vmem>>, vector<8x36xf32>
    %cst = arith.constant dense<0.000000e+00> : vector<8x64xf32>
    %3 = tpu.matmul %2, %1, %cst {dimension_numbers = #tpu.dot_dimension_numbers<[1], [0], [0], [1], [0, 0, 1, 1], [], []>} : vector<8x36xf32>, vector<36x64xf32>, vector<8x64xf32> -> vector<8x64xf32>
    %cst_4 = arith.constant dense<0.000000e+00> : vector<8xf32>
    %4 = vector.multi_reduction <add>, %3, %cst_4 [1] : vector<8x64xf32> to vector<8xf32>
    %5 = vector.shape_cast %4 : vector<8xf32> to vector<8x1xf32>
    %cst_5 = arith.constant 1.562500e-02 : f32
    %6 = vector.broadcast %cst_5 : f32 to vector<8x1xf32>
    %7 = arith.mulf %5, %6 : vector<8x1xf32>
    %8 = arith.mulf %3, %3 : vector<8x64xf32>
    %cst_6 = arith.constant dense<0.000000e+00> : vector<8xf32>
    %9 = vector.multi_reduction <add>, %8, %cst_6 [1] : vector<8x64xf32> to vector<8xf32>
    %10 = vector.shape_cast %9 : vector<8xf32> to vector<8x1xf32>
    %cst_7 = arith.constant 1.562500e-02 : f32
    %11 = vector.broadcast %cst_7 : f32 to vector<8x1xf32>
    %12 = arith.mulf %10, %11 : vector<8x1xf32>
    %13 = arith.mulf %7, %7 : vector<8x1xf32>
    %14 = arith.subf %12, %13 : vector<8x1xf32>
    %cst_8 = arith.constant 0.000000e+00 : f32
    %15 = vector.broadcast %cst_8 : f32 to vector<8x1xf32>
    %16 = arith.maximumf %14, %15 : vector<8x1xf32>
    %17 = vector.broadcast %7 : vector<8x1xf32> to vector<8x64xf32>
    %18 = arith.subf %3, %17 : vector<8x64xf32>
    %cst_9 = arith.constant 9.99999974E-6 : f32
    %19 = vector.broadcast %cst_9 : f32 to vector<8x1xf32>
    %20 = arith.addf %16, %19 : vector<8x1xf32>
    %21 = math.rsqrt %20 : vector<8x1xf32>
    %22 = vector.broadcast %21 : vector<8x1xf32> to vector<8x64xf32>
    %23 = arith.mulf %18, %22 : vector<8x64xf32>
    %cst_10 = arith.constant 0.000000e+00 : f32
    %24 = vector.broadcast %cst_10 : f32 to vector<8x64xf32>
    %25 = arith.maximumf %23, %24 : vector<8x64xf32>
    %c0_11 = arith.constant 0 : index
    %c0_12 = arith.constant 0 : index
    %c0_13 = arith.constant 0 : index
    %26 = vector.load %arg3[%c0_11, %c0_12, %c0_13] : memref<1x8x64xf32, #tpu.memory_space<vmem>>, vector<1x8x64xf32>
    %27 = vector.shape_cast %26 : vector<1x8x64xf32> to vector<8x64xf32>
    %28 = vector.shape_cast %25 : vector<8x64xf32> to vector<1x8x64xf32>
    tpu.vector_store %arg3[%c0_11, %c0_12, %c0_13], %28 {strides = array<i32>} : memref<1x8x64xf32, #tpu.memory_space<vmem>>, vector<1x8x64xf32>,
    return
  }
  func.func @transform_0(%arg0: i32) -> (i32, i32, i32) {
    %c0_i32 = arith.constant 0 : i32
    %c0_i32_0 = arith.constant 0 : i32
    %c0_i32_1 = arith.constant 0 : i32
    return %arg0, %c0_i32, %c0_i32_0 : i32, i32, i32
  }
  func.func @transform_1(%arg0: i32) -> (i32, i32) {
    %c0_i32 = arith.constant 0 : i32
    %c0_i32_0 = arith.constant 0 : i32
    %c0_i32_1 = arith.constant 0 : i32
    return %c0_i32, %c0_i32_0 : i32, i32
  }
  func.func @transform_2(%arg0: i32) -> (i32, i32, i32) {
    %c0_i32 = arith.constant 0 : i32
    %c0_i32_0 = arith.constant 0 : i32
    %c0_i32_1 = arith.constant 0 : i32
    return %arg0, %c0_i32, %c0_i32_0 : i32, i32, i32
  }
}

</mosaic_0001>

<bundles_post_ra>
// kernel: tpu_custom_call.1
= control target key start
LH: loop header
LB: loop body
LE: loop exit
PB: predicated region body
PF: predicated region fallthrough
CT: control target
= control target key end

     0   :  { %7 = vsyncpa [#allocation3], 0  ;;  %s503_s0 = inlined_call_operand.vmem [shape: f32[2,36,64], index: 0, kind: input, shape index: {}]   ;;  %s504_s1 = inlined_call_operand.vmem [shape: f32[8,36], index: 1, kind: input, shape index: {}]   ;;  %s505_s2 = inlined_call_operand.hbm [shape: f32[2,8,64], index: 2, kind: output, shape index: {}]  }
   0x1   :  { %9 = vsyncpa [#allocation3 + $0x1], 0  ;;  %s412_s9 = smov 0   ;;  %s414_s10 = smov 0  }
   0x2   :  { %s416_s11 = smov 0   ;;  %s418_s12 = smov 0  }
   0x3 LB: > { %s433_s13 = sadd.s32 4294967295, %s395_s12   ;;  %s279_s14 = sadd.s32 4294967294, %s395_s12   ;;  %s395_s12 = sphi %s418_s12, %s511_s12   ;;  %s391_s11 = sphi %s416_s11, %s510_s11   ;;  %s387_s10 = sphi %s414_s10, %s509_s10   ;;  %s383_s9 = sphi %s412_s9, %s508_s9  }
   0x4   : > { %s437_s15 = sadd.s32 1, %s395_s12   ;;  %s69_s16 = sadd.s32 1, %s391_s11 }
   0x5   : > { %s66_s17 = ssub.s32 %s395_s12, %s437_s15  ;;  %p79_p0 = scmp.ne.s32.totalorder %s391_s11, %s387_s10 }
   0x6   : > { %p67_p1 = scmp.eq.s32.totalorder %s66_s17, 0  ;;  %p80_p2 = scmp.eq.s32.totalorder %s433_s13, 1 }
   0x7   : > { %p85_p3 = scmp.ne.s32.totalorder %s387_s10, %s383_s9  ;;  %p86_p4 = scmp.eq.s32.totalorder %s279_s14, 1 }
   0x8   : > { %s448_s18 = scalar_select %p67_p1, %s391_s11, %s69_s16  }
   0x9   : > { %p450_p5 = por %p80_p2, %p79_p0  ;;  %p454_p6 = por %p86_p4, %p85_p3 }
   0xa   : > { %p282_p7 = scmp.ge.s32.totalorder %s395_s12, 1  ;;  %p115_p8 = scmp.lt.s32.totalorder %s395_s12, 3 }
   0xc   : > { %p116_p9 = pnand %p282_p7, %p115_p8 }
   0xd   : > { %p137_p10 = scmp.lt.s32.totalorder (!%p116_p9), %s433_s13, 1  ;;  %s134_s28 = sand.u32 (!%p116_p9), 1, %s387_s10  }
   0xe   : > { %119 = sbr.rel (%p116_p9) target bundleno = 318 (0x13e), region = 28  ;;  %s283_s29 = sshll.u32 (!%p116_p9), %s134_s28, 3 }
   0xf   : > { %s288_s30 = sshll.u32 (!%p116_p9), %s433_s13, 3  ;;  %s136_s6 = scalar_lea.vmem (!%p116_p9), [#allocation2], %s283_s29 }
  0x10   : > { %s215_s5 = scalar_lea.hbm (!%p116_p9), %s505_s2, %s288_s30  ;;  %s217_s7 = sshll.u32 (!%p116_p9), %s136_s6, 4  ;;  %s218_s7 = int_to_ptr.vmem [resolvable:$true] %s217_s7 }
  0x11   : > { %s219_s8 = sshll.u32 (!%p116_p9), %s215_s5, 4  ;;  %s220_s8 = int_to_ptr.hbm [resolvable:$true] %s219_s8 }
  0x12   : > { %s347_s14 = sshra.s32 (!%p116_p9), %s220_s8, 4  ;;  %s348_s14 = int_to_ptr.hbm [resolvable:$true] %s347_s14 }
  0x13   : > { %s138_s21 = scalar_select %p137_p10, %s433_s13, 1  ;;  %vm152_vm0 = vcmask 1043456   ;;  %v147_v5 = vld [vmem:[%s504_s1] sm:$0xff]  ;;  %vm148_vm1 = vcmask 293888   ;;  %vm176_vm2 = vcmask 523264  }
  0x14   : > { %s205_s13 = scalar_lea.sflag [#allocation3], %s134_s28  ;;  %s349_s16 = scalar_lea.hbm %s348_s14, 8 }
  0x15   : > { %s291_s22 = smul.u32 40, %s138_s21  ;;  %p350_p11 = scmp.ne.s32.totalorder %s348_s14, %s349_s16 }
  0x16   : > { %p354_p0 = scmp.lt.s32.totalorder %s348_s14, %s505_s2 }
  0x17   : > { %s141_s25 = scalar_lea.vmem %s503_s0, %s291_s22  ;;  %p351_p12 = pnand %p350_p11, %p450_p5 }
  0x18   : > { %v146_v0 = vld [vmem:[%s141_s25 + $0x20] sm:$0xf]  ;;  %v145_v1 = vld [vmem:[%s141_s25 + $0x18] sm:$0xff]  ;;  %v144_v2 = vld [vmem:[%s141_s25 + $0x10] sm:$0xff]  ;;  %s353_s22 = scalar_lea.hbm %s505_s2, 16 }
  0x19   : > { %285 = vmatpush.msk.msra.mxu0 %vm152_vm0, %v146_v0  ;;  %v143_v3 = vld [vmem:[%s141_s25 + $0x8] sm:$0xff]  ;;  %v142_v4 = vld [vmem:[%s141_s25] sm:$0xff]  ;;  %p352_p13 = pneg %p351_p12  ;;  %p355_p1 = scmp.lt.s32.totalorder %s353_s22, %s349_s16 }
  0x1b   : > { %168 = vmatpush.msra.mxu0 %v145_v1  ;;  %p356_p2 = por %p355_p1, %p354_p0 }
  0x1d   : > { %169 = vmatpush.msra.mxu0 %v144_v2  ;;  %p357_p3 = pnand %p356_p2, %p352_p13 }
  0x1f   : > { %170 = vmatpush.msra.mxu0 %v143_v3 }
  0x21   : > { %171 = vmatpush.msra.mxu0 %v142_v4 }
  0x22   : > { %286 = vmatmul.msk.f32.vlgmr.msra.gmra.mxu0 %vm148_vm1, %v147_v5 }
  0x9f   : > { %v173_v6 = vpop.f32.mrf.mxu0 }
  0xa0   : > { %v177_v7 = vsel %vm176_vm2, %v173_v6, 0.0  ;;  %v181_v8 = vmul.f32 %v173_v6, %v173_v6 }
  0xa1   : > { %178 = vadd.xlane.f32.xlu0 %v177_v7 }
  0xa2   : > { %v182_v9 = vsel %vm176_vm2, %v181_v8, 0.0 }
  0xa9   : > { %183 = vadd.xlane.f32.xlu0 %v182_v9 }
 0x114   : > { %v179_v10 = vpop.xlane.xlu0 %178 }
 0x115   : > { %v180_v11 = vmul.f32 0.015625, %v179_v10 }
 0x117   : > { %v186_v13 = vmul.f32 %v180_v11, %v180_v11  ;;  %v189_v24 = vsub.f32 %v173_v6, %v180_v11 }
 0x11c   : > { %v184_v12 = vpop.xlane.xlu0 %183 }
 0x11d   : > { %v185_v14 = vmul.f32 0.015625, %v184_v12 }
 0x11f   : > { %v187_v15 = vsub.f32 %v185_v14, %v186_v13 }
 0x121   : > { %v188_v16 = vmax.f32 %v187_v15, 0.0 }
 0x123   : > { %v190_v17 = vadd.f32 1e-05, %v188_v16 }
 0x125   : > { %331 = vrsqrt.f32 %v190_v17  ;;  %vm197_vm4 = vweird.f32 %v190_v17 }
 0x12b   : > { %v332_v18 = vpop.eup %331 }
 0x12c   : > { %v192_v19 = vmul.f32 %v332_v18, %v190_v17  ;;  %vm198_vm3 = vweird.f32 %v332_v18 }
 0x12d   : > { %vm199_vm5 = vmor %vm197_vm4, %vm198_vm3 }
 0x12e   : > { %v193_v20 = vmul.f32 %v332_v18, %v192_v19 }
 0x130   : > { %v194_v21 = vmul.f32 0.5, %v193_v20 }
 0x132   : > { %v195_v22 = vsub.f32 1.5, %v194_v21 }
 0x134   : > { %v196_v23 = vmul.f32 %v332_v18, %v195_v22 }
 0x136   : > { %v200_v25 = vsel %vm199_vm5, %v332_v18, %v196_v23 }
 0x137   : > { %v201_v26 = vmul.f32 %v200_v25, %v189_v24 }
 0x139   : > { %v202_v27 = vmax.f32 %v201_v26, 0.0 }
 0x13b   : > { %203 = vst.msk [vmem:[%s136_s6] sm:$0xff] %vm176_vm2, %v202_v27 }
 0x13c   : > { %360 = shalt.err (!%p357_p3)
}
 0x13d   : > { %292 = dma.vmem_to_hbm [thread:$0]  (%p450_p5), %s218_s7, 128, %s220_s8, %s205_s13  }
 0x13e PF: > { %p298_p4 = scmp.ge.s32.totalorder %s395_s12, 2  ;;  %s231_s25 = sand.u32 1, %s383_s9  }
 0x13f   : > { %s232_s26 = scalar_lea.sflag [#allocation3], %s231_s25 }
 0x140   : > { %p295_p7 = pnand %p298_p4, %p454_p6 }
 0x142   : > { %p296_p8 = pneg %p295_p7 }
 0x144   : > { %378 = dma.done.wait (%p296_p8), %s232_s26, 128  }
 0x145   : > { %380 = vsyncadd (%p296_p8), %s232_s26, 4294967168  ;;  %p12_p9 = scmp.ge.s32.totalorder %s437_s15, 4   ;;  %s508_s9 = smov %s387_s10 }
 0x146   : > { %s509_s10 = smov %s391_s11  ;;  %s510_s11 = smov %s448_s18 }
 0x147   : > { %s511_s12 = smov %s437_s15  ;;  %14 = sbr.rel (!%p12_p9) target bundleno = 3 (0x3), region = 63 }
 0x14c   :  { %238 = vsyncpa [#allocation3], 1 }
 0x14d   :  { %240 = vsyncpa [#allocation3 + $0x1], 1 }

</bundles_post_ra>
